<compile_context>
chip_gen: v7x
topology: tpu7x:2x2x1
jax: 0.10.0
libtpu: 0.0.40
codegen_flags: <defaults>
</compile_context>

<pallas_src>
import functools

import jax
import jax.numpy as jnp
from jax.experimental import pallas as pl
from jax.experimental.pallas import tpu as pltpu


def _round_up(x, m):
    return (x + m - 1) // m * m


def _clustering_kernel(patches_ref, wconv_ref, bconv_ref, whead_ref, bhead_ref,
                       feat_ref, out_ref, acc_ref, *, inv_hw):
    """One (batch-tile, spatial-tile) grid step.

    patches_ref : (TB, TS, Kp)  bf16 im2col patches (lane-dense, zero-padded contraction)
    wconv_ref   : (Kp, Cout)    bf16 conv weight in im2col layout
    bconv_ref   : (1, Cout)     f32 conv bias
    whead_ref   : (Cout, HKp)   bf16 fused cluster-head weights (zero-padded lanes)
    bhead_ref   : (1, HKp)      f32 fused cluster-head biases
    feat_ref    : (TB, Cout)    f32 backbone features (output, resident across spatial axis)
    out_ref     : (TB, HKp)     f32 fused cluster-head logits (output)
    acc_ref     : (TB, Cout)    f32 running spatial-sum accumulator (VMEM scratch)
    """
    s = pl.program_id(1)
    TB, TS, Kp = patches_ref.shape

    @pl.when(s == 0)
    def _init():
        acc_ref[...] = jnp.zeros_like(acc_ref)

    # Conv3x3 as a single im2col matmul on the MXU (f32 accumulation); bias+ReLU on VPU.
    patch = patches_ref[...].reshape(TB * TS, Kp)
    conv = jnp.dot(patch, wconv_ref[...], preferred_element_type=jnp.float32)
    conv = jnp.maximum(conv + bconv_ref[...], 0.0)

    # Partial global-average-pool: per-batch-element spatial sum of this tile
    # (running-sum accumulator; never materializes the full pre-pool activation).
    partials = [
        jnp.sum(conv[b * TS:(b + 1) * TS, :], axis=0, keepdims=True)
        for b in range(TB)
    ]
    acc_ref[...] += jnp.concatenate(partials, axis=0)

    @pl.when(s == pl.num_programs(1) - 1)
    def _finalize():
        feat = acc_ref[...] * inv_hw                      # normalize by the true H*W
        feat_ref[...] = feat.astype(feat_ref.dtype)
        logits = jnp.dot(feat.astype(jnp.bfloat16), whead_ref[...],
                         preferred_element_type=jnp.float32)
        out_ref[...] = (logits + bhead_ref[...]).astype(out_ref.dtype)


def clustering_model_forward(x_nchw, params, *, tile_b=None, tile_s=None):
    """Equivalent of ClusteringModel.forward(x, forward_pass='return_all').

    Returns (features, [head_0_logits, ..., head_{nheads-1}_logits]); the 'default'
    forward pass is just the list of head outputs.
    """
    wconv = params["wconv"]          # (3, 3, Cin, Cout)
    bconv = params["bconv"]          # (1, Cout)
    whead = params["whead"]          # (nheads, Cout, K)
    bhead = params["bhead"]          # (nheads, 1, K)

    B, Cin, H, W = x_nchw.shape
    Cout = wconv.shape[-1]
    nheads, _, K = whead.shape
    S = H * W

    # ---- layout plumbing in plain JAX (outside the kernel) ----
    # NCHW -> NHWC, pad spatial by 1, im2col into a lane-dense (B, S, Kp) bf16 slab.
    x = jnp.transpose(x_nchw, (0, 2, 3, 1)).astype(jnp.float32)
    xp = jnp.pad(x, ((0, 0), (1, 1), (1, 1), (0, 0)))
    taps = [xp[:, kh:kh + H, kw:kw + W, :] for kh in range(3) for kw in range(3)]
    patches = jnp.concatenate(taps, axis=-1).reshape(B, S, 9 * Cin)
    Kp = _round_up(9 * Cin, 128)
    patches = jnp.pad(patches, ((0, 0), (0, 0), (0, Kp - 9 * Cin)))
    patches = patches.astype(jnp.bfloat16)

    # Conv weight (3,3,Cin,Cout) -> (Kp, Cout) im2col layout, bf16.
    w2d = jnp.pad(wconv.reshape(9 * Cin, Cout), ((0, Kp - 9 * Cin), (0, 0)))
    w2d = w2d.astype(jnp.bfloat16)
    bconv2 = bconv.reshape(1, Cout).astype(jnp.float32)

    # Fused, lane-dense cluster heads: (nheads, Cout, K) -> (Cout, HKp).
    HK = nheads * K
    HKp = _round_up(HK, 128)
    whead_all = jnp.transpose(whead, (1, 0, 2)).reshape(Cout, HK)
    whead_all = jnp.pad(whead_all, ((0, 0), (0, HKp - HK))).astype(jnp.bfloat16)
    bhead_all = jnp.pad(bhead.reshape(1, HK), ((0, 0), (0, HKp - HK)))
    bhead_all = bhead_all.astype(jnp.float32)

    # ---- tiling ----
    TB = tile_b or (B if B <= 8 else 8)
    Bp = _round_up(B, TB)
    if Bp != B:
        patches = jnp.pad(patches, ((0, Bp - B), (0, 0), (0, 0)))
    if tile_s is not None:
        TS = tile_s
    else:
        TS = S
        for cand in (1024, 512, 256, 128):
            if S % cand == 0 and S // cand >= 2:
                TS = cand
                break

    grid = (Bp // TB, S // TS)   # (parallel batch tiles, arbitrary spatial reduction)

    kernel = functools.partial(_clustering_kernel, inv_hw=1.0 / float(S))

    feat, out_all = pl.pallas_call(
        kernel,
        out_shape=(
            jax.ShapeDtypeStruct((Bp, Cout), jnp.float32),
            jax.ShapeDtypeStruct((Bp, HKp), jnp.float32),
        ),
        grid=grid,
        in_specs=[
            pl.BlockSpec((TB, TS, Kp), lambda b, s: (b, s, 0)),
            pl.BlockSpec((Kp, Cout), lambda b, s: (0, 0)),
            pl.BlockSpec((1, Cout), lambda b, s: (0, 0)),
            pl.BlockSpec((Cout, HKp), lambda b, s: (0, 0)),
            pl.BlockSpec((1, HKp), lambda b, s: (0, 0)),
        ],
        out_specs=(
            pl.BlockSpec((TB, Cout), lambda b, s: (b, 0)),
            pl.BlockSpec((TB, HKp), lambda b, s: (b, 0)),
        ),
        scratch_shapes=[pltpu.VMEM((TB, Cout), jnp.float32)],
        compiler_params=pltpu.CompilerParams(
            dimension_semantics=("parallel", "arbitrary"),
            vmem_limit_bytes=32 * 1024 * 1024,
        ),
    )(patches, w2d, bconv2, whead_all, bhead_all)

    feat = feat[:B]
    out_all = out_all[:B, :HK]
    heads = [out_all[:, h * K:(h + 1) * K] for h in range(nheads)]
    return feat, heads


def init_params(key, cin=4, backbone_dim=128, nclusters=10, nheads=2):
    k1, k2, k3, k4 = jax.random.split(key, 4)
    wconv = jax.random.normal(k1, (3, 3, cin, backbone_dim), jnp.float32) * 0.05
    bconv = jax.random.normal(k2, (1, backbone_dim), jnp.float32) * 0.01
    whead = jax.random.normal(k3, (nheads, backbone_dim, nclusters), jnp.float32) * 0.05
    bhead = jax.random.normal(k4, (nheads, 1, nclusters), jnp.float32) * 0.01
    return {"wconv": wconv, "bconv": bconv, "whead": whead, "bhead": bhead}


def _reference_forward(x_nchw, params):
    """Pure-JAX f32 reference (mirrors the torch module's math)."""
    wconv, bconv, whead, bhead = (params["wconv"], params["bconv"],
                                  params["whead"], params["bhead"])
    x = jnp.transpose(x_nchw, (0, 2, 3, 1)).astype(jnp.float32)
    xp = jnp.pad(x, ((0, 0), (1, 1), (1, 1), (0, 0)))
    B, Hp, Wp, Cin = xp.shape
    H, W = Hp - 2, Wp - 2
    acc = jnp.zeros((B, H, W, wconv.shape[-1]), jnp.float32)
    for kh in range(3):
        for kw in range(3):
            acc = acc + jnp.einsum("bhwc,cd->bhwd",
                                   xp[:, kh:kh + H, kw:kw + W, :], wconv[kh, kw])
    acc = jnp.maximum(acc + bconv.reshape(1, 1, 1, -1), 0.0)
    feat = acc.mean(axis=(1, 2))
    heads = [feat @ whead[h] + bhead[h, 0] for h in range(whead.shape[0])]
    return feat, heads


if __name__ == "__main__":
    key = jax.random.PRNGKey(0)
    kx, kp = jax.random.split(key)

    B, Cin, H, W = 2, 4, 16, 16
    x = jax.random.normal(kx, (B, Cin, H, W), jnp.float32)
    params = init_params(kp, cin=Cin, backbone_dim=128, nclusters=10, nheads=2)

    fwd = jax.jit(clustering_model_forward)
    feat, heads = fwd(x, params)
    jax.block_until_ready(feat)
    for h in heads:
        jax.block_until_ready(h)

    # Verify against pure-JAX f32 reference (kernel matmuls use bf16 operands with
    # f32 accumulation, so a modest tolerance is appropriate).
    ref_feat, ref_heads = _reference_forward(x, params)
    assert feat.shape == ref_feat.shape
    assert jnp.allclose(feat, ref_feat, atol=1e-2, rtol=1e-2)
    for a, b in zip(heads, ref_heads):
        assert a.shape == b.shape
        assert jnp.allclose(a, b, atol=1e-2, rtol=1e-2)

    print("KERNEL_OK")
</pallas_src>

<mosaic_0001>
module attributes {stable_mosaic.version = 11 : i64} {
  func.func @_clustering_kernel(%arg0: i32, %arg1: i32, %arg2: memref<2x128x128xbf16, #tpu.memory_space<vmem>>, %arg3: memref<128x128xbf16, #tpu.memory_space<vmem>>, %arg4: memref<1x128xf32, #tpu.memory_space<vmem>>, %arg5: memref<128x128xbf16, #tpu.memory_space<vmem>>, %arg6: memref<1x128xf32, #tpu.memory_space<vmem>>, %arg7: memref<2x128xf32, #tpu.memory_space<vmem>>, %arg8: memref<2x128xf32, #tpu.memory_space<vmem>>, %arg9: memref<2x128xf32, #tpu.memory_space<vmem>>) attributes {dimension_semantics = [#tpu.dimension_semantics<parallel>, #tpu.dimension_semantics<arbitrary>], iteration_bounds = array<i64: 1, 2>, scalar_prefetch = 0 : i64, scratch_operands = 1 : i64, tpu.core_type = #tpu.core_type<tc>, window_params = [{transform_indices = @transform_0, window_bounds = array<i64: 2, 128, 128>}, {pipeline_mode = #tpu.pipeline_mode<synchronous>, transform_indices = @transform_1, window_bounds = array<i64: 128, 128>}, {pipeline_mode = #tpu.pipeline_mode<synchronous>, transform_indices = @transform_2, window_bounds = array<i64: 1, 128>}, {pipeline_mode = #tpu.pipeline_mode<synchronous>, transform_indices = @transform_3, window_bounds = array<i64: 128, 128>}, {pipeline_mode = #tpu.pipeline_mode<synchronous>, transform_indices = @transform_4, window_bounds = array<i64: 1, 128>}, {transform_indices = @transform_5, window_bounds = array<i64: 2, 128>}, {transform_indices = @transform_6, window_bounds = array<i64: 2, 128>}]} {
    %c0_i32 = arith.constant 0 : i32
    %0 = arith.cmpi eq, %arg1, %c0_i32 : i32
    %1 = arith.extui %0 : i1 to i32
    %c0_i32_0 = arith.constant 0 : i32
    %2 = arith.cmpi ne, %1, %c0_i32_0 : i32
    scf.if %2 {
      %cst_15 = arith.constant 0.000000e+00 : f32
      %25 = vector.broadcast %cst_15 : f32 to vector<2x128xf32>
      %c0_16 = arith.constant 0 : index
      %c0_17 = arith.constant 0 : index
      %26 = vector.load %arg9[%c0_16, %c0_17] : memref<2x128xf32, #tpu.memory_space<vmem>>, vector<2x128xf32>
      tpu.vector_store %arg9[%c0_16, %c0_17], %25 {strides = array<i32>} : memref<2x128xf32, #tpu.memory_space<vmem>>, vector<2x128xf32>,
    } else {
    }
    %c0 = arith.constant 0 : index
    %c0_1 = arith.constant 0 : index
    %c0_2 = arith.constant 0 : index
    %3 = vector.load %arg2[%c0, %c0_1, %c0_2] : memref<2x128x128xbf16, #tpu.memory_space<vmem>>, vector<2x128x128xbf16>
    %4 = vector.shape_cast %3 : vector<2x128x128xbf16> to vector<256x128xbf16>
    %c0_3 = arith.constant 0 : index
    %c0_4 = arith.constant 0 : index
    %5 = vector.load %arg3[%c0_3, %c0_4] : memref<128x128xbf16, #tpu.memory_space<vmem>>, vector<128x128xbf16>
    %cst = arith.constant dense<0.000000e+00> : vector<256x128xf32>
    %6 = tpu.matmul %4, %5, %cst {dimension_numbers = #tpu.dot_dimension_numbers<[1], [0], [0], [1], [0, 0, 1, 1], [], []>} : vector<256x128xbf16>, vector<128x128xbf16>, vector<256x128xf32> -> vector<256x128xf32>
    %c0_5 = arith.constant 0 : index
    %c0_6 = arith.constant 0 : index
    %7 = vector.load %arg4[%c0_5, %c0_6] : memref<1x128xf32, #tpu.memory_space<vmem>>, vector<1x128xf32>
    %8 = vector.broadcast %7 : vector<1x128xf32> to vector<256x128xf32>
    %9 = arith.addf %6, %8 : vector<256x128xf32>
    %cst_7 = arith.constant 0.000000e+00 : f32
    %10 = vector.broadcast %cst_7 : f32 to vector<256x128xf32>
    %11 = arith.maximumf %9, %10 : vector<256x128xf32>
    %12 = vector.extract_strided_slice %11 {offsets = [0, 0], sizes = [128, 128], strides = [1, 1]} : vector<256x128xf32> to vector<128x128xf32>
    %cst_8 = arith.constant dense<0.000000e+00> : vector<128xf32>
    %13 = vector.multi_reduction <add>, %12, %cst_8 [0] : vector<128x128xf32> to vector<128xf32>
    %14 = vector.shape_cast %13 : vector<128xf32> to vector<1x128xf32>
    %15 = vector.extract_strided_slice %11 {offsets = [128, 0], sizes = [128, 128], strides = [1, 1]} : vector<256x128xf32> to vector<128x128xf32>
    %cst_9 = arith.constant dense<0.000000e+00> : vector<128xf32>
    %16 = vector.multi_reduction <add>, %15, %cst_9 [0] : vector<128x128xf32> to vector<128xf32>
    %17 = vector.shape_cast %16 : vector<128xf32> to vector<1x128xf32>
    %c0_10 = arith.constant 0 : index
    %c0_11 = arith.constant 0 : index
    %18 = vector.load %arg9[%c0_10, %c0_11] : memref<2x128xf32, #tpu.memory_space<vmem>>, vector<2x128xf32>
    %19 = tpu.concatenate %14, %17 in 0 : vector<1x128xf32>, vector<1x128xf32> -> vector<2x128xf32>
    %20 = arith.addf %18, %19 : vector<2x128xf32>
    %c0_12 = arith.constant 0 : index
    %c0_13 = arith.constant 0 : index
    %21 = vector.load %arg9[%c0_12, %c0_13] : memref<2x128xf32, #tpu.memory_space<vmem>>, vector<2x128xf32>
    tpu.vector_store %arg9[%c0_12, %c0_13], %20 {strides = array<i32>} : memref<2x128xf32, #tpu.memory_space<vmem>>, vector<2x128xf32>,
    %c1_i32 = arith.constant 1 : i32
    %22 = arith.cmpi eq, %arg1, %c1_i32 : i32
    %23 = arith.extui %22 : i1 to i32
    %c0_i32_14 = arith.constant 0 : i32
    %24 = arith.cmpi ne, %23, %c0_i32_14 : i32
    scf.if %24 {
      %c0_15 = arith.constant 0 : index
      %c0_16 = arith.constant 0 : index
      %25 = vector.load %arg9[%c0_15, %c0_16] : memref<2x128xf32, #tpu.memory_space<vmem>>, vector<2x128xf32>
      %cst_17 = arith.constant 3.906250e-03 : f32
      %26 = vector.broadcast %cst_17 : f32 to vector<2x128xf32>
      %27 = arith.mulf %25, %26 : vector<2x128xf32>
      %c0_18 = arith.constant 0 : index
      %c0_19 = arith.constant 0 : index
      %28 = vector.load %arg7[%c0_18, %c0_19] : memref<2x128xf32, #tpu.memory_space<vmem>>, vector<2x128xf32>
      tpu.vector_store %arg7[%c0_18, %c0_19], %27 {strides = array<i32>} : memref<2x128xf32, #tpu.memory_space<vmem>>, vector<2x128xf32>,
      %29 = arith.truncf %27 : vector<2x128xf32> to vector<2x128xbf16>
      %c0_20 = arith.constant 0 : index
      %c0_21 = arith.constant 0 : index
      %30 = vector.load %arg5[%c0_20, %c0_21] : memref<128x128xbf16, #tpu.memory_space<vmem>>, vector<128x128xbf16>
      %cst_22 = arith.constant dense<0.000000e+00> : vector<2x128xf32>
      %31 = tpu.matmul %29, %30, %cst_22 {dimension_numbers = #tpu.dot_dimension_numbers<[1], [0], [0], [1], [0, 0, 1, 1], [], []>} : vector<2x128xbf16>, vector<128x128xbf16>, vector<2x128xf32> -> vector<2x128xf32>
      %c0_23 = arith.constant 0 : index
      %c0_24 = arith.constant 0 : index
      %32 = vector.load %arg6[%c0_23, %c0_24] : memref<1x128xf32, #tpu.memory_space<vmem>>, vector<1x128xf32>
      %33 = vector.broadcast %32 : vector<1x128xf32> to vector<2x128xf32>
      %34 = arith.addf %31, %33 : vector<2x128xf32>
      %c0_25 = arith.constant 0 : index
      %c0_26 = arith.constant 0 : index
      %35 = vector.load %arg8[%c0_25, %c0_26] : memref<2x128xf32, #tpu.memory_space<vmem>>, vector<2x128xf32>
      tpu.vector_store %arg8[%c0_25, %c0_26], %34 {strides = array<i32>} : memref<2x128xf32, #tpu.memory_space<vmem>>, vector<2x128xf32>,
    } else {
    }
    return
  }
  func.func @transform_0(%arg0: i32, %arg1: i32) -> (i32, i32, i32) {
    %c0_i32 = arith.constant 0 : i32
    %c0_i32_0 = arith.constant 0 : i32
    return %arg0, %arg1, %c0_i32 : i32, i32, i32
  }
  func.func @transform_1(%arg0: i32, %arg1: i32) -> (i32, i32) {
    %c0_i32 = arith.constant 0 : i32
    %c0_i32_0 = arith.constant 0 : i32
    %c0_i32_1 = arith.constant 0 : i32
    return %c0_i32, %c0_i32_0 : i32, i32
  }
  func.func @transform_2(%arg0: i32, %arg1: i32) -> (i32, i32) {
    %c0_i32 = arith.constant 0 : i32
    %c0_i32_0 = arith.constant 0 : i32
    %c0_i32_1 = arith.constant 0 : i32
    return %c0_i32, %c0_i32_0 : i32, i32
  }
  func.func @transform_3(%arg0: i32, %arg1: i32) -> (i32, i32) {
    %c0_i32 = arith.constant 0 : i32
    %c0_i32_0 = arith.constant 0 : i32
    %c0_i32_1 = arith.constant 0 : i32
    return %c0_i32, %c0_i32_0 : i32, i32
  }
  func.func @transform_4(%arg0: i32, %arg1: i32) -> (i32, i32) {
    %c0_i32 = arith.constant 0 : i32
    %c0_i32_0 = arith.constant 0 : i32
    %c0_i32_1 = arith.constant 0 : i32
    return %c0_i32, %c0_i32_0 : i32, i32
  }
  func.func @transform_5(%arg0: i32, %arg1: i32) -> (i32, i32) {
    %c0_i32 = arith.constant 0 : i32
    %c0_i32_0 = arith.constant 0 : i32
    return %arg0, %c0_i32 : i32, i32
  }
  func.func @transform_6(%arg0: i32, %arg1: i32) -> (i32, i32) {
    %c0_i32 = arith.constant 0 : i32
    %c0_i32_0 = arith.constant 0 : i32
    return %arg0, %c0_i32 : i32, i32
  }
}

</mosaic_0001>

<bundles_post_ra>
// kernel: clustering_model_forward.1
= control target key start
LH: loop header
LB: loop body
LE: loop exit
PB: predicated region body
PF: predicated region fallthrough
CT: control target
= control target key end

     0   :  { %12 = vsyncpa [#allocation5], 0  ;;  %s1458_s21 = smov 0   ;;  %s1460_s22 = smov 0   ;;  %s1677_s0 = inlined_call_operand.vmem [shape: bf16[2,256,128], index: 0, kind: input, shape index: {}]   ;;  %s1678_s1 = inlined_call_operand.vmem [shape: bf16[128,128], index: 1, kind: input, shape index: {}]   ;;  %s1679_s2 = inlined_call_operand.vmem [shape: f32[1,128], index: 2, kind: input, shape index: {}]   ;;  %s1680_s3 = inlined_call_operand.vmem [shape: bf16[128,128], index: 3, kind: input, shape index: {}]   ;;  %s1681_s4 = inlined_call_operand.vmem [shape: f32[1,128], index: 4, kind: input, shape index: {}]   ;;  %s1682_s5 = inlined_call_operand.hbm [shape: f32[2,128], index: 5, kind: output, shape index: {0}]   ;;  %s1683_s6 = inlined_call_operand.vmem [shape: f32[2,128], index: 6, kind: output, shape index: {1}]  }
   0x1   :  { %s1462_s23 = smov 0   ;;  %s1464_s24 = smov 0  }
   0x2   :  { %s1466_s25 = smov 0  }
   0x3 LB: > { %s1100_s26 = sadd.s32 4294967295, %s1417_s25   ;;  %s27_s27 = sadd.s32 1, %s1413_s24  ;;  %s1417_s25 = sphi %s1466_s25, %s18_s25   ;;  %s1413_s24 = sphi %s1464_s24, %s1688_s24   ;;  %s1409_s23 = sphi %s1462_s23, %s1687_s23   ;;  %s1405_s22 = sphi %s1460_s22, %s1686_s22   ;;  %s1401_s21 = sphi %s1458_s21, %s1685_s21  }
   0x4   : > { %p28_p0 = scmp.ge.s32.totalorder %s27_s27, 2  ;;  %p46_p1 = scmp.ne.s32.totalorder %s1405_s22, %s1401_s21 }
   0x5   : > { %p47_p2 = scmp.eq.s32.totalorder %s1417_s25, 0  ;;  %s39_s29 = sadd.s32 1, %s1405_s22 }
   0x6   : > { %s1690_s27 = smov (%p28_p0, %s27_s27), 0  ;;  %p1102_p5 = scmp.ge.s32.totalorder %s1417_s25, 2 }
   0x7   : > { %p48_p3 = por %p47_p2, %p46_p1  ;;  %s35_s28 = ssub.s32 %s1413_s24, %s1690_s27 }
   0x8   : > { %p37_p4 = scmp.eq.s32.totalorder %s35_s28, 0  ;;  %220 = sbr.rel (%p1102_p5) target bundleno = 27 (0x1b), region = 32 }
   0xa   : > { %s1494_s30 = scalar_select %p37_p4, %s1405_s22, %s39_s29  }
   0xf   : > { %223 = sbr.rel (!%p48_p3) target bundleno = 27 (0x1b), region = 36  ;;  %s225_s7 = sand.u32 (%p48_p3), 1, %s1405_s22  }
  0x10   : > { %s1149_s8 = sshll.u32 (%p48_p3), %s1413_s24, 6  ;;  %s1103_s9 = sshll.u32 (%p48_p3), %s225_s7, 7 }
  0x11   : > { %s1502_s12 = scalar_lea.vmem (%p48_p3), %s1677_s0, %s1149_s8  ;;  %s227_s13 = scalar_lea.vmem (%p48_p3), [#allocation3], %s1103_s9 }
  0x12   : > { %v249_v0 = vld [vmem:[%s1502_s12] sm:$0xff] (%p48_p3)   ;;  %v253_v1 = vld [vmem:[%s1502_s12 + $0x8] sm:$0xff] (%p48_p3)   ;;  %v257_v2 = vld [vmem:[%s1502_s12 + $0x10] sm:$0xff] (%p48_p3)  }
  0x13   : > { %250 = vst [vmem:[%s227_s13] sm:$0xff] (%p48_p3), %v249_v0   ;;  %254 = vst [vmem:[%s227_s13 + $0x8] sm:$0xff] (%p48_p3), %v253_v1   ;;  %v261_v3 = vld [vmem:[%s1502_s12 + $0x18] sm:$0xff] (%p48_p3)   ;;  %v265_v4 = vld [vmem:[%s1502_s12 + $0x20] sm:$0xff] (%p48_p3)  }
  0x14   : > { %258 = vst [vmem:[%s227_s13 + $0x10] sm:$0xff] (%p48_p3), %v257_v2   ;;  %v269_v5 = vld [vmem:[%s1502_s12 + $0x28] sm:$0xff] (%p48_p3)   ;;  %262 = vst [vmem:[%s227_s13 + $0x18] sm:$0xff] (%p48_p3), %v261_v3   ;;  %v273_v6 = vld [vmem:[%s1502_s12 + $0x30] sm:$0xff] (%p48_p3)  }
  0x15   : > { %266 = vst [vmem:[%s227_s13 + $0x20] sm:$0xff] (%p48_p3), %v265_v4   ;;  %270 = vst [vmem:[%s227_s13 + $0x28] sm:$0xff] (%p48_p3), %v269_v5   ;;  %v277_v7 = vld [vmem:[%s1502_s12 + $0x38] sm:$0xff] (%p48_p3)   ;;  %v281_v8 = vld [vmem:[%s1502_s12 + $0x80] sm:$0xff] (%p48_p3)  }
  0x16   : > { %274 = vst [vmem:[%s227_s13 + $0x30] sm:$0xff] %v273_v6   ;;  %278 = vst [vmem:[%s227_s13 + $0x38] sm:$0xff] %v277_v7   ;;  %v285_v9 = vld [vmem:[%s1502_s12 + $0x88] sm:$0xff]   ;;  %v289_v10 = vld [vmem:[%s1502_s12 + $0x90] sm:$0xff]  }
  0x17   : > { %282 = vst [vmem:[%s227_s13 + $0x40] sm:$0xff] %v281_v8   ;;  %v293_v11 = vld [vmem:[%s1502_s12 + $0x98] sm:$0xff]   ;;  %286 = vst [vmem:[%s227_s13 + $0x48] sm:$0xff] %v285_v9   ;;  %v297_v12 = vld [vmem:[%s1502_s12 + $0xa0] sm:$0xff]  }
  0x18   : > { %290 = vst [vmem:[%s227_s13 + $0x50] sm:$0xff] %v289_v10   ;;  %294 = vst [vmem:[%s227_s13 + $0x58] sm:$0xff] %v293_v11   ;;  %v301_v13 = vld [vmem:[%s1502_s12 + $0xa8] sm:$0xff]   ;;  %v305_v14 = vld [vmem:[%s1502_s12 + $0xb0] sm:$0xff]  }
  0x19   : > { %298 = vst [vmem:[%s227_s13 + $0x60] sm:$0xff] %v297_v12   ;;  %302 = vst [vmem:[%s227_s13 + $0x68] sm:$0xff] %v301_v13   ;;  %v309_v15 = vld [vmem:[%s1502_s12 + $0xb8] sm:$0xff]  }
  0x1a   : > { %306 = vst [vmem:[%s227_s13 + $0x70] sm:$0xff] %v305_v14   ;;  %310 = vst [vmem:[%s227_s13 + $0x78] sm:$0xff] %v309_v15  }
  0x1b PF: > { %p1106_p6 = scmp.ge.s32.totalorder %s1417_s25, 1  ;;  %p398_p7 = scmp.lt.s32.totalorder %s1417_s25, 3 }
  0x1d   : > { %p399_p8 = pnand %p1106_p6, %p398_p7 }
  0x1e   : > { %s405_s14 = sand.u32 (!%p399_p8), 1, %s1401_s21   ;;  %p1108_p9 = scmp.ne.s32.totalorder (!%p399_p8), %s1409_s23, 0 }
  0x1f   : > { %402 = sbr.rel (%p399_p8) target bundleno = 595 (0x253), region = 77  ;;  %s1107_s15 = sshll.u32 (!%p399_p8), %s405_s14, 7 }
  0x20   : > { %s1523_s16 = scalar_lea.vmem (!%p399_p8), [#allocation3], %s1107_s15 }
  0x26   : > { %443 = sbr.rel (%p1108_p9) target bundleno = 45 (0x2d), region = 85  ;;  %v1419_v16 = vmov (!%p1108_p9), 0.0  }
  0x27   : > { %444 = vst [vmem:[#allocation2] sm:$0x3] (!%p1108_p9), %v1419_v16 }
  0x2d PF: > { %v1317_v17 = vld [vmem:[%s1678_s1] sm:$0xff]   ;;  %v1318_v18 = vld [vmem:[%s1678_s1 + $0x8] sm:$0xff]   ;;  %v1319_v19 = vld [vmem:[%s1678_s1 + $0x10] sm:$0xff]   ;;  %vm880_vm0 = vcmask 1040384   ;;  %p1134_p10 = scmp.ne.s32.totalorder %s1409_s23, 1 }
  0x2e   : > { %1183 = vmatprep.subr.bf16.mxu0 %v1317_v17  ;;  %1251 = vmatprep.subr.bf16.mxu1 %v1317_v17  ;;  %v1320_v20 = vld [vmem:[%s1678_s1 + $0x18] sm:$0xff]   ;;  %v1325_v21 = vld [vmem:[%s1523_s16] sm:$0xff]   ;;  %v1323_v25 = vld [vmem:[%s1678_s1 + $0x30] sm:$0xff]   ;;  %vm1421_vm1 = vmmov (!%p1134_p10), 0  }
  0x2f   : > { %1184 = vmatpush3.bf16.msra.mxu0 %v1317_v17  ;;  %1259 = vmatpush3.bf16.msra.mxu1 %v1317_v17  ;;  %v1326_v22 = vld [vmem:[%s1523_s16 + $0x40] sm:$0xff]   ;;  %v1324_v26 = vld [vmem:[%s1678_s1 + $0x38] sm:$0xff]   ;;  %v1327_v27 = vld [vmem:[%s1523_s16 + $0x8] sm:$0xff]  }
  0x30   : > { %1185 = vmatprep.subr.bf16.mxu0 %v1318_v18  ;;  %1252 = vmatprep.subr.bf16.mxu1 %v1318_v18  ;;  %v1321_v23 = vld [vmem:[%s1678_s1 + $0x20] sm:$0xff]   ;;  %v1322_v24 = vld [vmem:[%s1678_s1 + $0x28] sm:$0xff]   ;;  %v1329_v29 = vld [vmem:[%s1523_s16 + $0x10] sm:$0xff]  }
  0x31   : > { %1199 = vmatprep.mubr.bf16.mxu0 %v1325_v21  ;;  %1215 = vmatprep.mubr.bf16.mxu1 %v1326_v22  ;;  %v1328_v28 = vld [vmem:[%s1523_s16 + $0x48] sm:$0xff]   ;;  %v1330_v30 = vld [vmem:[%s1523_s16 + $0x50] sm:$0xff]   ;;  %v1331_v31 = vld [vmem:[%s1523_s16 + $0x18] sm:$0xff]  }
  0x32   : > { %v1332_v32 = vld [vmem:[%s1523_s16 + $0x58] sm:$0xff]   ;;  %v1333_v33 = vld [vmem:[%s1523_s16 + $0x20] sm:$0xff]   ;;  %v1335_v35 = vld [vmem:[%s1523_s16 + $0x28] sm:$0xff]  }
  0x33   : > { %1186 = vmatpush3.bf16.msra.mxu0 %v1318_v18  ;;  %1260 = vmatpush3.bf16.msra.mxu1 %v1318_v18  ;;  %v1334_v34 = vld [vmem:[%s1523_s16 + $0x60] sm:$0xff]   ;;  %v1336_v36 = vld [vmem:[%s1523_s16 + $0x68] sm:$0xff]   ;;  %v1337_v37 = vld [vmem:[%s1523_s16 + $0x30] sm:$0xff]  }
  0x34   : > { %1187 = vmatprep.subr.bf16.mxu0 %v1319_v19  ;;  %1253 = vmatprep.subr.bf16.mxu1 %v1319_v19  ;;  %v1338_v38 = vld [vmem:[%s1523_s16 + $0x70] sm:$0xff]   ;;  %v1339_v39 = vld [vmem:[%s1523_s16 + $0x38] sm:$0xff]  }
  0x35   : > { %v1340_v40 = vld [vmem:[%s1523_s16 + $0x78] sm:$0xff]  }
  0x36   : > { %v1569_v41 = vld [vmem:[%s1679_s2] ss:$0 sm:$0xff] }
  0x37   : > { %1188 = vmatpush3.bf16.msra.mxu0 %v1319_v19  ;;  %1261 = vmatpush3.bf16.msra.mxu1 %v1319_v19 }
  0x38   : > { %1189 = vmatprep.subr.bf16.mxu0 %v1320_v20  ;;  %1254 = vmatprep.subr.bf16.mxu1 %v1320_v20 }
  0x3b   : > { %1190 = vmatpush3.bf16.msra.mxu0 %v1320_v20  ;;  %1262 = vmatpush3.bf16.msra.mxu1 %v1320_v20 }
  0x3c   : > { %1191 = vmatprep.subr.bf16.mxu0 %v1321_v23  ;;  %1255 = vmatprep.subr.bf16.mxu1 %v1321_v23 }
  0x3f   : > { %1192 = vmatpush3.bf16.msra.mxu0 %v1321_v23  ;;  %1263 = vmatpush3.bf16.msra.mxu1 %v1321_v23 }
  0x40   : > { %1193 = vmatprep.subr.bf16.mxu0 %v1322_v24  ;;  %1256 = vmatprep.subr.bf16.mxu1 %v1322_v24 }
  0x43   : > { %1194 = vmatpush3.bf16.msra.mxu0 %v1322_v24  ;;  %1264 = vmatpush3.bf16.msra.mxu1 %v1322_v24 }
  0x44   : > { %1195 = vmatprep.subr.bf16.mxu0 %v1323_v25  ;;  %1257 = vmatprep.subr.bf16.mxu1 %v1323_v25 }
  0x47   : > { %1196 = vmatpush3.bf16.msra.mxu0 %v1323_v25  ;;  %1265 = vmatpush3.bf16.msra.mxu1 %v1323_v25 }
  0x48   : > { %1197 = vmatprep.subr.bf16.mxu0 %v1324_v26  ;;  %1258 = vmatprep.subr.bf16.mxu1 %v1324_v26 }
  0x4b   : > { %1198 = vmatpush3.bf16.msra.mxu0 %v1324_v26  ;;  %1266 = vmatpush3.bf16.msra.mxu1 %v1324_v26 }
  0x4e   : > { %1200 = vmatmul.mubr.bf16.vlgmr.msra.gmra.mrb[0].mxu0 %v1327_v27  ;;  %1216 = vmatmul.mubr.bf16.vlgmr.msra.gmra.mrb[0].mxu1 %v1328_v28 }
  0x4f   : > { %1203 = vmatprep.mubr.bf16.mxu0 %v1329_v29  ;;  %1219 = vmatprep.mubr.bf16.mxu1 %v1330_v30 }
  0x56   : > { %1204 = vmatmul.mubr.bf16.gmra.mrb[4].mxu0 %v1331_v31  ;;  %1220 = vmatmul.mubr.bf16.gmra.mrb[4].mxu1 %v1332_v32 }
  0x57   : > { %1207 = vmatprep.mubr.bf16.mxu0 %v1333_v33  ;;  %1223 = vmatprep.mubr.bf16.mxu1 %v1334_v34 }
  0x5e   : > { %1208 = vmatmul.mubr.bf16.gmra.mrb[8].mxu0 %v1335_v35  ;;  %1224 = vmatmul.mubr.bf16.gmra.mrb[8].mxu1 %v1336_v36 }
  0x5f   : > { %1211 = vmatprep.mubr.bf16.mxu0 %v1337_v37  ;;  %1227 = vmatprep.mubr.bf16.mxu1 %v1338_v38 }
  0x66   : > { %1212 = vmatmul.mubr.bf16.gmra.mrb[12].mxu0 %v1339_v39  ;;  %1228 = vmatmul.mubr.bf16.gmra.mrb[12].mxu1 %v1340_v40 }
 0x121   : > { %v1201_v42 = vpop.f32.mrb[0].mxu0  ;;  %v1217_v43 = vpop.f32.mrb[0].mxu1 }
 0x122   : > { %v678_v44 = vpop.f32.mrb[1].mxu0  ;;  %v742_v45 = vpop.f32.mrb[1].mxu1  ;;  %v687_v52 = vadd.f32 %v1201_v42, %v1569_v41  ;;  %v751_v53 = vadd.f32 %v1217_v43, %v1569_v41 }
 0x123   : > { %v679_v46 = vadd.f32 %v1569_v41, %v678_v44  ;;  %v743_v47 = vadd.f32 %v1569_v41, %v742_v45  ;;  %v1202_v48 = vpop.f32.mrb[2].mxu0  ;;  %v1218_v49 = vpop.f32.mrb[2].mxu1 }
 0x124   : > { %v681_v50 = vpop.f32.mrb[3].mxu0  ;;  %v745_v51 = vpop.f32.mrb[3].mxu1  ;;  %v690_v56 = vadd.f32 %v1202_v48, %v1569_v41  ;;  %v754_v57 = vadd.f32 %v1218_v49, %v1569_v41  ;;  %v807_v62 = vmax.f32 %v687_v52, 0.0  ;;  %v823_v63 = vmax.f32 %v751_v53, 0.0 }
 0x125   : > { %v682_v54 = vadd.f32 %v1569_v41, %v681_v50  ;;  %v746_v55 = vadd.f32 %v1569_v41, %v745_v51  ;;  %v805_v58 = vmax.f32 %v679_v46, 0.0  ;;  %v821_v59 = vmax.f32 %v743_v47, 0.0 }
 0x126   : > { %v808_v4 = vmax.f32 %v690_v56, 0.0  ;;  %v824_v5 = vmax.f32 %v754_v57, 0.0 }
 0x127   : > { %v806_v60 = vmax.f32 %v682_v54, 0.0  ;;  %v822_v61 = vmax.f32 %v746_v55, 0.0 }
 0x129   : > { %v837_v0 = vadd.f32 %v806_v60, %v805_v58  ;;  %v858_v1 = vadd.f32 %v822_v61, %v821_v59  ;;  %v1205_v2 = vpop.f32.mrb[4].mxu0  ;;  %v1221_v3 = vpop.f32.mrb[4].mxu1 }
 0x12a   : > { %v694_v6 = vpop.f32.mrb[5].mxu0  ;;  %v758_v7 = vpop.f32.mrb[5].mxu1  ;;  %v703_v20 = vadd.f32 %v1205_v2, %v1569_v41  ;;  %v767_v21 = vadd.f32 %v1221_v3, %v1569_v41 }
 0x12b   : > { %v838_v8 = vadd.f32 %v837_v0, %v807_v62  ;;  %v859_v9 = vadd.f32 %v858_v1, %v823_v63  ;;  %v695_v10 = vadd.f32 %v1569_v41, %v694_v6  ;;  %v759_v11 = vadd.f32 %v1569_v41, %v758_v7  ;;  %v1206_v12 = vpop.f32.mrb[6].mxu0  ;;  %v1222_v13 = vpop.f32.mrb[6].mxu1 }
 0x12c   : > { %v697_v14 = vpop.f32.mrb[7].mxu0  ;;  %v761_v15 = vpop.f32.mrb[7].mxu1  ;;  %v706_v26 = vadd.f32 %v1206_v12, %v1569_v41  ;;  %v770_v27 = vadd.f32 %v1222_v13, %v1569_v41  ;;  %v811_v32 = vmax.f32 %v703_v20, 0.0  ;;  %v827_v33 = vmax.f32 %v767_v21, 0.0 }
 0x12d   : > { %v809_v16 = vmax.f32 %v695_v10, 0.0  ;;  %v839_v17 = vadd.f32 %v838_v8, %v808_v4  ;;  %v825_v18 = vmax.f32 %v759_v11, 0.0  ;;  %v860_v19 = vadd.f32 %v859_v9, %v824_v5 }
 0x12e   : > { %v698_v22 = vadd.f32 %v1569_v41, %v697_v14  ;;  %v762_v23 = vadd.f32 %v1569_v41, %v761_v15  ;;  %v812_v43 = vmax.f32 %v706_v26, 0.0  ;;  %v828_v44 = vmax.f32 %v770_v27, 0.0 }
 0x12f   : > { %v840_v24 = vadd.f32 %v839_v17, %v809_v16  ;;  %v861_v25 = vadd.f32 %v860_v19, %v825_v18 }
 0x130   : > { %v810_v28 = vmax.f32 %v698_v22, 0.0  ;;  %v826_v29 = vmax.f32 %v762_v23, 0.0 }
 0x131   : > { %v1209_v30 = vpop.f32.mrb[8].mxu0  ;;  %v1225_v31 = vpop.f32.mrb[8].mxu1 }
 0x132   : > { %v841_v34 = vadd.f32 %v840_v24, %v810_v28  ;;  %v862_v35 = vadd.f32 %v861_v25, %v826_v29  ;;  %v710_v36 = vpop.f32.mrb[9].mxu0  ;;  %v774_v37 = vpop.f32.mrb[9].mxu1  ;;  %v719_v49 = vadd.f32 %v1209_v30, %v1569_v41  ;;  %v783_v50 = vadd.f32 %v1225_v31, %v1569_v41 }
 0x133   : > { %v711_v38 = vadd.f32 %v1569_v41, %v710_v36  ;;  %v775_v39 = vadd.f32 %v1569_v41, %v774_v37  ;;  %v1210_v40 = vpop.f32.mrb[10].mxu0  ;;  %v1226_v42 = vpop.f32.mrb[10].mxu1 }
 0x134   : > { %v842_v45 = vadd.f32 %v841_v34, %v811_v32  ;;  %v863_v46 = vadd.f32 %v862_v35, %v827_v33  ;;  %v713_v47 = vpop.f32.mrb[11].mxu0  ;;  %v777_v48 = vpop.f32.mrb[11].mxu1  ;;  %v722_v57 = vadd.f32 %v1210_v40, %v1569_v41  ;;  %v786_v58 = vadd.f32 %v1226_v42, %v1569_v41 }
 0x135   : > { %v813_v51 = vmax.f32 %v711_v38, 0.0  ;;  %v829_v52 = vmax.f32 %v775_v39, 0.0  ;;  %v714_v55 = vadd.f32 %v1569_v41, %v713_v47  ;;  %v778_v56 = vadd.f32 %v1569_v41, %v777_v48 }
 0x136   : > { %v843_v53 = vadd.f32 %v842_v45, %v812_v43  ;;  %v864_v54 = vadd.f32 %v863_v46, %v828_v44  ;;  %v815_v1 = vmax.f32 %v719_v49, 0.0  ;;  %v831_v2 = vmax.f32 %v783_v50, 0.0 }
 0x137   : > { %v814_v61 = vmax.f32 %v714_v55, 0.0  ;;  %v830_v62 = vmax.f32 %v778_v56, 0.0  ;;  %v816_v11 = vmax.f32 %v722_v57, 0.0  ;;  %v832_v12 = vmax.f32 %v786_v58, 0.0  ;;  %v1341_v56 = vld [vmem:[%s1680_s3] sm:$0xff] (!%p1134_p10)   ;;  %v1342_v58 = vld [vmem:[%s1680_s3 + $0x8] sm:$0xff] (!%p1134_p10)  }
 0x138   : > { %v844_v59 = vadd.f32 %v843_v53, %v813_v51  ;;  %v865_v60 = vadd.f32 %v864_v54, %v829_v52  ;;  %v879_v53 = vld [vmem:[#allocation2] sm:$0x3]  ;;  %v1420_v57 = vmov (!%p1134_p10), 0.0  }
 0x139   : > { %v1213_v63 = vpop.f32.mrb[12].mxu0  ;;  %v1229_v0 = vpop.f32.mrb[12].mxu1  ;;  %1231 = vmatprep.subr.bf16.mxu0 (!%p1134_p10), %v1420_v57  ;;  %1247 = vmatprep.mubr.msk.bf16.mxu0 (!%p1134_p10), %vm1421_vm1, %v1420_v57 }
 0x13a   : > { %v845_v3 = vadd.f32 %v844_v59, %v814_v61  ;;  %v866_v4 = vadd.f32 %v865_v60, %v830_v62  ;;  %v726_v5 = vpop.f32.mrb[13].mxu0  ;;  %v790_v6 = vpop.f32.mrb[13].mxu1  ;;  %v735_v17 = vadd.f32 %v1213_v63, %v1569_v41  ;;  %v799_v18 = vadd.f32 %v1229_v0, %v1569_v41  ;;  %1232 = vmatpush3.bf16.msra.mxu0 (!%p1134_p10), %v1341_v56  ;;  %v1343_v59 = vld [vmem:[%s1680_s3 + $0x10] sm:$0xff] (!%p1134_p10)   ;;  %v1344_v62 = vld [vmem:[%s1680_s3 + $0x18] sm:$0xff] (!%p1134_p10)   ;;  %v1345_v63 = vld [vmem:[%s1680_s3 + $0x20] sm:$0xff] (!%p1134_p10)  }
 0x13b   : > { %v727_v7 = vadd.f32 %v1569_v41, %v726_v5  ;;  %v791_v8 = vadd.f32 %v1569_v41, %v790_v6  ;;  %v1214_v9 = vpop.f32.mrb[14].mxu0  ;;  %v1230_v10 = vpop.f32.mrb[14].mxu1  ;;  %1233 = vmatprep.subr.bf16.mxu0 (!%p1134_p10), %v1420_v57  ;;  %v1346_v0 = vld [vmem:[%s1680_s3 + $0x28] sm:$0xff] (!%p1134_p10)  }
 0x13c   : > { %v846_v13 = vadd.f32 %v845_v3, %v815_v1  ;;  %v867_v14 = vadd.f32 %v866_v4, %v831_v2  ;;  %v729_v15 = vpop.f32.mrb[15].mxu0  ;;  %v793_v16 = vpop.f32.mrb[15].mxu1  ;;  %v738_v25 = vadd.f32 %v1214_v9, %v1569_v41  ;;  %v802_v26 = vadd.f32 %v1230_v10, %v1569_v41  ;;  %v1347_v1 = vld [vmem:[%s1680_s3 + $0x30] sm:$0xff] (!%p1134_p10)   ;;  %v1348_v2 = vld [vmem:[%s1680_s3 + $0x38] sm:$0xff] (!%p1134_p10)   ;;  %v1135_v4 = vld [vmem:[%s1681_s4] ss:$0 sm:$0xff] (!%p1134_p10) }
 0x13d   : > { %v817_v19 = vmax.f32 %v727_v7, 0.0  ;;  %v833_v20 = vmax.f32 %v791_v8, 0.0  ;;  %v730_v23 = vadd.f32 %v1569_v41, %v729_v15  ;;  %v794_v24 = vadd.f32 %v1569_v41, %v793_v16 }
 0x13e   : > { %v847_v21 = vadd.f32 %v846_v13, %v816_v11  ;;  %v868_v22 = vadd.f32 %v867_v14, %v832_v12  ;;  %v819_v31 = vmax.f32 %v735_v17, 0.0  ;;  %v835_v32 = vmax.f32 %v799_v18, 0.0  ;;  %1234 = vmatpush3.bf16.msra.mxu0 (!%p1134_p10), %v1342_v58 }
 0x13f   : > { %v818_v29 = vmax.f32 %v730_v23, 0.0  ;;  %v834_v30 = vmax.f32 %v794_v24, 0.0  ;;  %v820_v35 = vmax.f32 %v738_v25, 0.0  ;;  %v836_v36 = vmax.f32 %v802_v26, 0.0  ;;  %1235 = vmatprep.subr.bf16.mxu0 (!%p1134_p10), %v1420_v57 }
 0x140   : > { %v848_v27 = vadd.f32 %v847_v21, %v817_v19  ;;  %v869_v28 = vadd.f32 %v868_v22, %v833_v20 }
 0x142   : > { %v849_v33 = vadd.f32 %v848_v27, %v818_v29  ;;  %v870_v34 = vadd.f32 %v869_v28, %v834_v30  ;;  %1236 = vmatpush3.bf16.msra.mxu0 (!%p1134_p10), %v1343_v59 }
 0x143   : > { %1237 = vmatprep.subr.bf16.mxu0 (!%p1134_p10), %v1420_v57 }
 0x144   : > { %v850_v37 = vadd.f32 %v849_v33, %v819_v31  ;;  %v871_v38 = vadd.f32 %v870_v34, %v835_v32 }
 0x146   : > { %v851_v39 = vadd.f32 %v850_v37, %v820_v35  ;;  %v872_v40 = vadd.f32 %v871_v38, %v836_v36  ;;  %1238 = vmatpush3.bf16.msra.mxu0 (!%p1134_p10), %v1344_v62 }
 0x147   : > { %1239 = vmatprep.subr.bf16.mxu0 (!%p1134_p10), %v1420_v57 }
 0x148   : > { %v852_v42 = vrot.slane %v851_v39, 4  ;;  %v873_v43 = vrot.slane %v872_v40, 4 }
 0x14a   : > { %v853_v44 = vadd.f32 %v852_v42, %v851_v39  ;;  %v874_v45 = vadd.f32 %v873_v43, %v872_v40  ;;  %1240 = vmatpush3.bf16.msra.mxu0 (!%p1134_p10), %v1345_v63 }
 0x14b   : > { %1241 = vmatprep.subr.bf16.mxu0 (!%p1134_p10), %v1420_v57 }
 0x14c   : > { %v854_v46 = vrot.slane %v853_v44, 2  ;;  %v875_v41 = vrot.slane %v874_v45, 2 }
 0x14e   : > { %v855_v47 = vadd.f32 %v854_v46, %v853_v44  ;;  %v876_v48 = vadd.f32 %v875_v41, %v874_v45  ;;  %1242 = vmatpush3.bf16.msra.mxu0 (!%p1134_p10), %v1346_v0 }
 0x14f   : > { %1243 = vmatprep.subr.bf16.mxu0 (!%p1134_p10), %v1420_v57 }
 0x150   : > { %v856_v49 = vrot.slane %v855_v47, 1  ;;  %v877_v50 = vrot.slane %v876_v48, 1 }
 0x151   : > { %887 = sbr.rel (%p1134_p10) target bundleno = 570 (0x23a), region = 89 }
 0x152   : > { %v857_v51 = vadd.f32 %v856_v49, %v855_v47  ;;  %v878_v52 = vadd.f32 %v877_v50, %v876_v48  ;;  %1244 = vmatpush3.bf16.msra.mxu0 (!%p1134_p10), %v1347_v1 }
 0x153   : > { %1245 = vmatprep.subr.bf16.mxu0 (!%p1134_p10), %v1420_v57 }
 0x154   : > { %v881_v54 = vsel %vm880_vm0, %v857_v51, %v878_v52 }
 0x155   : > { %v882_v55 = vadd.f32 %v881_v54, %v879_v53 }
 0x156   : > { %1246 = vmatpush3.bf16.msra.mxu0 (!%p1134_p10), %v1348_v2 }
 0x157   : > { %883 = vst [vmem:[#allocation2] sm:$0x3] %v882_v55 }
 0x15e   : > { %v888_v60 = vld [vmem:[#allocation2] sm:$0x3] }
 0x15f   : > { %v889_v61 = vmul.f32 0.00390625, %v888_v60 }
 0x161   : > { %890 = vst [vmem:[#allocation4] sm:$0x3] %v889_v61  ;;  %v891_v3 = vpack.c.bf16 %v889_v61, %v889_v61 }
 0x163   : > { %1248 = vmatmul.mubr.bf16.vlgmr.msra.gmra.mrb[0].mxu0 %v891_v3 }
 0x236   : > { %v997_v5 = vpop.f32.mrb[0].mxu0 }
 0x237   : > { %v998_v6 = vadd.f32 %v1135_v4, %v997_v5  ;;  %v1249_v7 = vpop.f32.mrb[1].mxu0 }
 0x238   : > { %v1000_v8 = vpop.f32.mrb[2].mxu0 }
 0x239   : > { %1003 = vst [vmem:[%s1683_s6] sm:$0x3] %v998_v6  ;;  %v1250_v9 = vpop.f32.mrb[3].mxu0 }
 0x23a PF: > { %p1636_p11 = scmp.eq.s32.totalorder %s1100_s26, 1  ;;  %s1422_s21 = smov [#allocation4]  }
 0x23b   : > { %s1017_s28 = sshll.u32 %s1422_s21, 4  ;;  %s1018_s28 = int_to_ptr.vmem [resolvable:$true] %s1017_s28 }
 0x23c   : > { %s1349_s29 = scalar_lea.vmem %s1018_s28, 32  ;;  %p1356_p1 = scmp.lt.s32.totalorder %s1018_s28, %s1018_s28 }
 0x23d   : > { %p1350_p12 = scmp.ne.s32.totalorder %s1018_s28, %s1349_s29  ;;  %p1357_p2 = scmp.lt.s32.totalorder %s1349_s29, %s1349_s29 }
 0x23f   : > { %p1351_p13 = pnand %p1350_p12, %p1636_p11  ;;  %p1358_p3 = por %p1357_p2, %p1356_p1 }
 0x241   : > { %p1352_p0 = pneg %p1351_p13 }
 0x243   : > { %p1359_p4 = pnand %p1358_p3, %p1352_p0 }
 0x245   : > { %1362 = shalt.err (!%p1359_p4)
}
 0x246   : > { %s1363_s26 = scalar_lea.hbm %s1682_s5, 32 }
 0x247   : > { %p1364_p5 = scmp.ne.s32.totalorder %s1682_s5, %s1363_s26  ;;  %p1369_p8 = scmp.lt.u32.totalorder %s1363_s26, %s1682_s5 }
 0x249   : > { %p1365_p6 = pnand %p1364_p5, %p1636_p11 }
 0x24b   : > { %p1366_p7 = pneg %p1365_p6 }
 0x24d   : > { %p1371_p9 = pnand %p1369_p8, %p1366_p7 }
 0x24f   : > { %1374 = shalt.err (!%p1371_p9)
}
 0x250   : > { %1268 = dma.vmem_to_hbm [thread:$0]  (%p1636_p11), %s1018_s28, 32, %s1682_s5, [#allocation5]  }
 0x251   : > { %1396 = dma.done.wait (%p1636_p11), [#allocation5], 32  }
 0x252   : > { %1398 = vsyncadd (%p1636_p11), [#allocation5], 4294967264 }
 0x253 PF: > { %s18_s25 = sadd.s32 1, %s1417_s25   ;;  %s1685_s21 = smov %s1405_s22 }
 0x254   : > { %p15_p10 = scmp.ge.s32.totalorder %s18_s25, 4   ;;  %s1686_s22 = smov %s1494_s30 }
 0x255   : > { %s1687_s23 = smov %s1413_s24  ;;  %s1688_s24 = smov %s1690_s27 }
 0x256   :  { %17 = sbr.rel (!%p15_p10) target bundleno = 3 (0x3), region = 134 }
 0x25d   :  { %1040 = vsyncpa [#allocation5], 1 }
 0x25e   :  { %1042 = vsyncpa [#allocation5 + $0x1], 1 }

</bundles_post_ra>
